<compile_context>
chip_gen: v5e
topology: v5e:2x2
jax: 0.10.0
libtpu: 0.0.40
codegen_flags: <defaults>
</compile_context>

<pallas_src>
import functools

import jax
import jax.numpy as jnp
from jax import lax
from jax.experimental import pallas as pl
from jax.experimental.pallas import tpu as pltpu


# ---------------------------------------------------------------------------
# One-time probe of the pltpu.roll rotation convention.
# We need shifted[:, i] = x[:, i + s].  With numpy's convention
# (roll(x, a)[i] == x[i - a]) the amount is (-s) % n; with the opposite
# convention it is s % n.  Detect once, eagerly, with a tiny kernel so the
# conv is correct regardless of the convention.  Must be called outside any
# trace the first time (done in RandomApplyCustomPallas.__init__ / eager use).
# ---------------------------------------------------------------------------
@functools.lru_cache(maxsize=None)
def _roll_follows_numpy_convention() -> bool:
    def probe_kernel(x_ref, o_ref):
        o_ref[...] = pltpu.roll(x_ref[...], 1, 1)

    x = jnp.broadcast_to(jnp.arange(128, dtype=jnp.float32), (8, 128))
    out = pl.pallas_call(
        probe_kernel,
        out_shape=jax.ShapeDtypeStruct((8, 128), jnp.float32),
    )(x)
    return bool(jax.device_get(out)[0, 0] == 127.0)


def _conv3x3_kernel(x_ref, w_ref, b_ref, o_ref, stk_ref, *, H, W, numpy_roll):
    """Whole batch in one block, fully lane-dense layout, one fused dot/image.

    x_ref:   (N*C, H*W)    images stacked along sublanes, pixels on lanes
    w_ref:   (Co, 9*C)     lane-dense weight slab, K ordered (kh, kw, c)
    b_ref:   (Co, 1)       bias (fp32, broadcast over lanes)
    o_ref:   (N*Co, H*W)   lane-dense output slab
    stk_ref: (N, 9*C, H*W) VMEM scratch holding the stacked 3x3 taps
    """
    HW = H * W
    N, K9C, _ = stk_ref.shape
    Co = w_ref.shape[0]
    C = K9C // 9
    cdt = stk_ref.dtype                     # compute dtype (f32 or bf16)

    # Pixel coordinates along the lane axis and the four boundary predicates,
    # computed once (zero-padding border handled by masks, not jnp.pad).
    pos = lax.broadcasted_iota(jnp.int32, (1, HW), 1)
    row = pos // W
    col = pos - row * W
    ok = {-1: (row >= 1, col >= 1), 1: (row <= H - 2, col <= W - 2)}

    # (shift, mask) per tap, tap-major k = kh*3 + kw; masks built once.
    taps = []
    for kh in range(3):
        for kw in range(3):
            dh, dw = kh - 1, kw - 1
            m = None
            if dh != 0:
                m = ok[dh][0]
            if dw != 0:
                m = ok[dw][1] if m is None else (m & ok[dw][1])
            taps.append((dh * W + dw, m))

    w = w_ref[...]                           # single tile, single load
    b = b_ref[...]                           # (Co, 1) fp32
    zero = jnp.zeros((), dtype=cdt)

    for n in range(N):                       # static unroll over the tiny batch
        x_n = x_ref[n * C:(n + 1) * C, :].astype(cdt)        # one cast, (C, HW)
        for k, (s, m) in enumerate(taps):
            if s == 0:
                t = x_n
            else:
                amount = ((-s) % HW) if numpy_roll else (s % HW)
                t = pltpu.roll(x_n, amount, 1)   # t[:, i] == x_n[:, i + s]
                t = jnp.where(m, t, zero)        # zero-padding border
            stk_ref[n, k * C:(k + 1) * C, :] = t
        # One fused MXU contraction per image: (Co, 9C) @ (9C, HW) -> (Co, HW).
        acc = jnp.dot(w, stk_ref[n], preferred_element_type=jnp.float32)
        o_ref[n * Co:(n + 1) * Co, :] = (acc + b).astype(o_ref.dtype)


@functools.partial(jax.jit, static_argnums=(3, 4))
def _conv3x3_jit(x_nchw, weight, bias, numpy_roll, use_bf16):
    N, C, H, W = x_nchw.shape
    Co = weight.shape[0]
    HW = H * W
    cdt = jnp.bfloat16 if use_bf16 else jnp.float32

    # Only contiguity-preserving reshapes on the activation (free); the weight
    # prep is a tiny one-time op.  K axis ordered (kh, kw, c) to match the
    # tap-major stacking in the kernel; pre-cast so no in-loop weight casts.
    x_flat = x_nchw.reshape(N * C, HW)
    w_slab = jnp.transpose(weight, (0, 2, 3, 1)).reshape(Co, 9 * C).astype(cdt)
    b2 = bias.reshape(Co, 1).astype(jnp.float32)

    kernel = functools.partial(_conv3x3_kernel, H=H, W=W, numpy_roll=numpy_roll)

    out_flat = pl.pallas_call(
        kernel,
        out_shape=jax.ShapeDtypeStruct((N * Co, HW), x_nchw.dtype),
        grid=(1,),                                   # single grid step
        in_specs=[
            pl.BlockSpec((N * C, HW), lambda i: (0, 0)),   # full-sublane block
            pl.BlockSpec((Co, 9 * C), lambda i: (0, 0)),   # resident weight slab
            pl.BlockSpec((Co, 1), lambda i: (0, 0)),       # resident bias
        ],
        out_specs=pl.BlockSpec((N * Co, HW), lambda i: (0, 0)),
        scratch_shapes=[pltpu.VMEM((N, 9 * C, HW), cdt)],  # stacked-tap slab
    )(x_flat, w_slab, b2)

    return out_flat.reshape(N, Co, H, W)


def conv3x3_pallas(x_nchw, weight, bias, *, use_bf16=False):
    """3x3, stride-1, pad-1 conv. x_nchw: (N, C, H, W); weight: (Co, C, 3, 3)."""
    assert weight.shape[2:] == (3, 3)
    numpy_roll = _roll_follows_numpy_convention()
    return _conv3x3_jit(x_nchw, weight, bias, numpy_roll, use_bf16)


class RandomApplyCustomPallas:
    """JAX/Pallas port of RandomApplyCustom wrapping Conv2d(C, C, 3, padding=1)."""

    def __init__(self, weight, bias, p=0.5, training=True, use_bf16=False):
        self.weight = weight
        self.bias = bias
        self.p = p
        self.training = training
        self.use_bf16 = use_bf16
        _roll_follows_numpy_convention()   # warm the probe cache outside any trace

    def __call__(self, x, key):
        if not self.training:
            return x
        apply_fn = lambda y: conv3x3_pallas(
            y, self.weight, self.bias, use_bf16=self.use_bf16)
        # `self.training and random.random() < self.p`
        coin = jax.random.uniform(key, (), dtype=jnp.float32)
        return lax.cond(coin < self.p, apply_fn, lambda y: y, x)


if __name__ == "__main__":
    key = jax.random.PRNGKey(0)
    k_x, k_w, k_b, k_coin = jax.random.split(key, 4)

    N, C, H, W = 2, 4, 16, 16
    x = jax.random.normal(k_x, (N, C, H, W), dtype=jnp.float32)

    # Deterministic synthetic Conv2d(C, C, 3) parameters.
    fan_in = C * 3 * 3
    bound = 1.0 / jnp.sqrt(fan_in)
    weight = jax.random.uniform(k_w, (C, C, 3, 3), minval=-bound, maxval=bound,
                                dtype=jnp.float32)
    bias = jax.random.uniform(k_b, (C,), minval=-bound, maxval=bound,
                              dtype=jnp.float32)

    mod = RandomApplyCustomPallas(weight, bias, p=0.5, training=True)
    out = jax.block_until_ready(mod(x, k_coin))
    assert out.shape == x.shape and out.dtype == x.dtype

    # Reference conv for correctness checks.
    conv_ref = lax.conv_general_dilated(
        x, weight, window_strides=(1, 1), padding=((1, 1), (1, 1)),
        dimension_numbers=("NCHW", "OIHW", "NCHW"),
    ) + bias.reshape(1, C, 1, 1)

    # fp32 Pallas path.
    conv_f32 = jax.block_until_ready(conv3x3_pallas(x, weight, bias))
    assert jnp.allclose(conv_f32, conv_ref, atol=1e-3, rtol=1e-3)

    # bf16-operand / fp32-accumulate path (v6e / v7x MXU), looser tolerance.
    conv_bf16 = jax.block_until_ready(
        conv3x3_pallas(x, weight, bias, use_bf16=True))
    assert jnp.allclose(conv_bf16, conv_ref, atol=5e-2, rtol=5e-2)

    # Eval mode is always identity.
    mod_eval = RandomApplyCustomPallas(weight, bias, p=0.5, training=False)
    out_eval = jax.block_until_ready(mod_eval(x, k_coin))
    assert jnp.array_equal(out_eval, x)

    print("KERNEL_OK")
</pallas_src>

<mosaic_0001>
module attributes {stable_mosaic.version = 11 : i64} {
  func.func @probe_kernel(%arg0: memref<8x128xf32, #tpu.memory_space<vmem>>, %arg1: memref<8x128xf32, #tpu.memory_space<vmem>>) attributes {dimension_semantics = [], scalar_prefetch = 0 : i64, scratch_operands = 0 : i64, tpu.core_type = #tpu.core_type<tc>} {
    %c0 = arith.constant 0 : index
    %c0_0 = arith.constant 0 : index
    %0 = vector.load %arg0[%c0, %c0_0] : memref<8x128xf32, #tpu.memory_space<vmem>>, vector<8x128xf32>
    %c1_i32 = arith.constant 1 : i32
    %1 = tpu.dynamic_rotate %0 by %c1_i32 dim 1 : vector<8x128xf32>, i32 -> vector<8x128xf32>
    %c0_1 = arith.constant 0 : index
    %c0_2 = arith.constant 0 : index
    %2 = vector.load %arg1[%c0_1, %c0_2] : memref<8x128xf32, #tpu.memory_space<vmem>>, vector<8x128xf32>
    tpu.vector_store %arg1[%c0_1, %c0_2], %1 {strides = array<i32>} : memref<8x128xf32, #tpu.memory_space<vmem>>, vector<8x128xf32>,
    return
  }
}

</mosaic_0001>

<bundles_post_ra>
// kernel: tpu_custom_call.1
= control target key start
LH: loop header
LB: loop body
LE: loop exit
PB: predicated region body
PF: predicated region fallthrough
CT: control target
= control target key end

     0   :  { %6 = vsyncpa [#allocation3], 0  ;;  %s118_s0 = inlined_call_operand.hbm [shape: f32[8,128], index: 0, kind: input, shape index: {}]   ;;  %s119_s1 = inlined_call_operand.hbm [shape: f32[8,128], index: 1, kind: output, shape index: {}]  }
   0x1   :  { %7 = vsyncpa [#allocation4], 0  ;;  %s13_s8 = sshll.u32 %s118_s0, 4  ;;  %s99_s9 = smov [#allocation2]   ;;  %s14_s8 = int_to_ptr.hbm [resolvable:$true] %s13_s8 }
   0x2   :  { %s15_s10 = sshll.u32 %s99_s9, 4  ;;  %s16_s10 = int_to_ptr.vmem [resolvable:$true] %s15_s10 }
   0x3   :  { %18 = dma.hbm_to_vmem [thread:$0]  %s14_s8, 128, %s16_s10, [#allocation3]  }
   0x4   :  { %95 = dma.done.wait [#allocation3], 128  }
   0x5   :  { %96 = vsyncadd [#allocation3], 4294967168  ;;  %v23_v0 = vld [vmem:[#allocation2] sm:$0xff]  ;;  %s100_s11 = smov 1   ;;  %s101_s12 = smov [#allocation5]  }
   0x6   :  { %24 = vrot.lane.b32.xlu0 %v23_v0, %s100_s11  ;;  %s32_s13 = sshll.u32 %s101_s12, 4  ;;  %s34_s16 = sshll.u32 %s119_s1, 4  ;;  %s33_s13 = int_to_ptr.vmem [resolvable:$true] %s32_s13  ;;  %s35_s16 = int_to_ptr.hbm [resolvable:$true] %s34_s16 }
  0x78   :  { %v25_v1 = vpop.permute.xlu0 %24 }
  0x79   :  { %26 = vst [vmem:[#allocation5] sm:$0xff] %v25_v1 }
  0x7a   :  { %37 = dma.vmem_to_hbm [thread:$0]  %s33_s13, 128, %s35_s16, [#allocation4]  }
  0x7b   :  { %97 = dma.done.wait [#allocation4], 128  }
  0x7c   :  { %98 = vsyncadd [#allocation4], 4294967168 }
  0x7d   :  { %42 = vsyncpa [#allocation3], 1 }
  0x7e   :  { %43 = vsyncpa [#allocation4], 1 }

</bundles_post_ra>
